<compile_context>
chip_gen: v7x
topology: tpu7x:2x2x1
jax: 0.10.0
libtpu: 0.0.40
codegen_flags: <defaults>
</compile_context>

<pallas_src>
import functools

import jax
import jax.numpy as jnp
from jax.experimental import pallas as pl
from jax.experimental.pallas import tpu as pltpu


def _round_up(x, m):
    return (x + m - 1) // m * m


def _critic_kernel(x_ref, w_ref, p_ref, out_ref, *, sa, sa_pad, hidden):
    # x_ref : (SA, TB)        concat([state, action], -1) transposed
    # w_ref : (SA_pad+H, SA)  rows [0:SA)        = block-diag(Ws, Wa)  (out, in)
    #                         rows [SA_pad:+H)   = W1                  (out, in)
    # p_ref : (P, 4)          col0=b_first, col1=b1, col2=wo, col3[0]=bo
    x = x_ref[...]                                   # (SA, TB)

    w_first = w_ref[0:sa, :]                         # (SA, SA)
    w1 = w_ref[sa_pad:sa_pad + hidden, :]            # (H, SA)
    b_first = p_ref[0:sa, 0:1]                       # (SA, 1)
    b1 = p_ref[0:hidden, 1:2]                        # (H, 1)
    wo = p_ref[0:hidden, 2:3]                        # (H, 1)
    bo = p_ref[0:1, 3:4]                             # (1, 1)

    # state_input / action_input linears (block-diagonal -> one MXU dot).
    h0 = jnp.dot(w_first, x, preferred_element_type=jnp.float32) + b_first  # (SA, TB)
    # fc1
    h1 = jnp.dot(w1, h0, preferred_element_type=jnp.float32) + b1           # (H, TB)
    # output head: 1-wide GEMV done on VPU (mul) + XLU (sublane reduce).
    out_ref[...] = jnp.sum(h1 * wo, axis=0, keepdims=True) + bo             # (1, TB)


def pack_params(raw, state_dim, action_dim, hidden_dim):
    """Pack the 8 PyTorch-layout tensors into 2 kernel operands."""
    ws, bs, wa, ba, w1, b1, wo, bo = raw
    sa = state_dim + action_dim
    sa_pad = _round_up(sa, 8)

    # Stacked weights: block-diag(Ws, Wa) on top, W1 below (sublane-aligned).
    w_all = jnp.zeros((sa_pad + hidden_dim, sa), jnp.float32)
    w_all = w_all.at[:state_dim, :state_dim].set(ws)
    w_all = w_all.at[state_dim:sa, state_dim:].set(wa)
    w_all = w_all.at[sa_pad:sa_pad + hidden_dim, :].set(w1)

    rows = max(_round_up(sa, 8), _round_up(hidden_dim, 8), 8)
    p = jnp.zeros((rows, 4), jnp.float32)
    p = p.at[:state_dim, 0].set(bs)
    p = p.at[state_dim:sa, 0].set(ba)
    p = p.at[:hidden_dim, 1].set(b1)
    p = p.at[:hidden_dim, 2].set(wo.reshape(-1))
    p = p.at[0, 3].set(bo.reshape(-1)[0])
    return w_all, p


def critic_forward(state, action, packed, state_dim, action_dim, hidden_dim):
    """state: (B, S) f32, action: (B, A) f32 -> (B, 1) f32."""
    w_all, p = packed
    B = state.shape[0]
    sa = state_dim + action_dim
    sa_pad = _round_up(sa, 8)

    # Lane-dense input slab: batch on the lane axis.
    x_t = jnp.concatenate([state, action], axis=-1).astype(jnp.float32).T  # (SA, B)

    # Batch tile: multiple of 128 when tiled, else the full (small) batch.
    tb = 512 if B > 512 else B
    grid = (pl.cdiv(B, tb),)

    kernel = functools.partial(
        _critic_kernel, sa=sa, sa_pad=sa_pad, hidden=hidden_dim)

    out_t = pl.pallas_call(
        kernel,
        out_shape=jax.ShapeDtypeStruct((1, B), jnp.float32),
        grid=grid,
        in_specs=[
            # Streamed batch tiles.
            pl.BlockSpec((sa, tb), lambda i: (0, i)),
            # Weights / biases: same block every step -> VMEM resident.
            pl.BlockSpec(w_all.shape, lambda i: (0, 0)),
            pl.BlockSpec(p.shape, lambda i: (0, 0)),
        ],
        out_specs=pl.BlockSpec((1, tb), lambda i: (0, i)),
        compiler_params=pltpu.CompilerParams(
            dimension_semantics=("parallel",)),
    )(x_t, w_all, p)

    return out_t.T  # (B, 1)


def init_raw_params(key, state_dim, action_dim, hidden_dim):
    """PyTorch nn.Linear-style init, weights in (out, in) layout."""
    ks = jax.random.split(key, 8)

    def linear(kw, kb, fan_in, fan_out):
        bound = 1.0 / (fan_in ** 0.5)
        w = jax.random.uniform(kw, (fan_out, fan_in), jnp.float32, -bound, bound)
        b = jax.random.uniform(kb, (fan_out,), jnp.float32, -bound, bound)
        return w, b

    ws, bs = linear(ks[0], ks[1], state_dim, state_dim)
    wa, ba = linear(ks[2], ks[3], action_dim, action_dim)
    w1, b1 = linear(ks[4], ks[5], state_dim + action_dim, hidden_dim)
    wo, bo = linear(ks[6], ks[7], hidden_dim, 1)
    return (ws, bs, wa, ba, w1, b1, wo, bo)


def critic_reference(state, action, raw):
    ws, bs, wa, ba, w1, b1, wo, bo = raw
    s = state @ ws.T + bs
    a = action @ wa.T + ba
    h = jnp.concatenate([s, a], axis=-1) @ w1.T + b1
    return h @ wo.T + bo


if __name__ == "__main__":
    batch = 8
    state_dim = 16
    action_dim = 8
    hidden_dim = 32

    key = jax.random.PRNGKey(0)
    k_params, k_state, k_action = jax.random.split(key, 3)

    raw = init_raw_params(k_params, state_dim, action_dim, hidden_dim)
    packed = pack_params(raw, state_dim, action_dim, hidden_dim)

    state = jax.random.normal(k_state, (batch, state_dim), jnp.float32)
    action = jax.random.normal(k_action, (batch, action_dim), jnp.float32)

    out = critic_forward(state, action, packed, state_dim, action_dim, hidden_dim)
    out = jax.block_until_ready(out)

    ref = critic_reference(state, action, raw)
    assert out.shape == (batch, 1), out.shape
    assert jnp.allclose(out, ref, atol=1e-4, rtol=1e-4), (out, ref)

    print("KERNEL_OK")
</pallas_src>

<mosaic_0001>
module attributes {stable_mosaic.version = 11 : i64} {
  func.func @_critic_kernel(%arg0: i32, %arg1: memref<24x8xf32, #tpu.memory_space<vmem>>, %arg2: memref<56x24xf32, #tpu.memory_space<vmem>>, %arg3: memref<32x4xf32, #tpu.memory_space<vmem>>, %arg4: memref<1x8xf32, #tpu.memory_space<vmem>>) attributes {dimension_semantics = [#tpu.dimension_semantics<parallel>], iteration_bounds = array<i64: 1>, scalar_prefetch = 0 : i64, scratch_operands = 0 : i64, tpu.core_type = #tpu.core_type<tc>, window_params = [{transform_indices = @transform_0, window_bounds = array<i64: 24, 8>}, {pipeline_mode = #tpu.pipeline_mode<synchronous>, transform_indices = @transform_1, window_bounds = array<i64: 56, 24>}, {pipeline_mode = #tpu.pipeline_mode<synchronous>, transform_indices = @transform_2, window_bounds = array<i64: 32, 4>}, {transform_indices = @transform_3, window_bounds = array<i64: 1, 8>}]} {
    %c0 = arith.constant 0 : index
    %c0_0 = arith.constant 0 : index
    %0 = vector.load %arg1[%c0, %c0_0] : memref<24x8xf32, #tpu.memory_space<vmem>>, vector<24x8xf32>
    %c0_1 = arith.constant 0 : index
    %c0_2 = arith.constant 0 : index
    %1 = vector.load %arg2[%c0_1, %c0_2] : memref<56x24xf32, #tpu.memory_space<vmem>>, vector<24x24xf32>
    %c24 = arith.constant 24 : index
    %c0_3 = arith.constant 0 : index
    %2 = vector.load %arg2[%c24, %c0_3] : memref<56x24xf32, #tpu.memory_space<vmem>>, vector<32x24xf32>
    %c0_4 = arith.constant 0 : index
    %c0_5 = arith.constant 0 : index
    %3 = vector.load %arg3[%c0_4, %c0_5] : memref<32x4xf32, #tpu.memory_space<vmem>>, vector<24x1xf32>
    %c0_6 = arith.constant 0 : index
    %c1 = arith.constant 1 : index
    %4 = vector.load %arg3[%c0_6, %c1] : memref<32x4xf32, #tpu.memory_space<vmem>>, vector<32x1xf32>
    %c0_7 = arith.constant 0 : index
    %c2 = arith.constant 2 : index
    %5 = vector.load %arg3[%c0_7, %c2] : memref<32x4xf32, #tpu.memory_space<vmem>>, vector<32x1xf32>
    %c0_8 = arith.constant 0 : index
    %c3 = arith.constant 3 : index
    %6 = vector.load %arg3[%c0_8, %c3] : memref<32x4xf32, #tpu.memory_space<vmem>>, vector<1x1xf32>
    %cst = arith.constant dense<0.000000e+00> : vector<24x8xf32>
    %7 = tpu.matmul %1, %0, %cst {dimension_numbers = #tpu.dot_dimension_numbers<[1], [0], [0], [1], [0, 0, 1, 1], [], []>} : vector<24x24xf32>, vector<24x8xf32>, vector<24x8xf32> -> vector<24x8xf32>
    %8 = vector.broadcast %3 : vector<24x1xf32> to vector<24x8xf32>
    %9 = arith.addf %7, %8 : vector<24x8xf32>
    %cst_9 = arith.constant dense<0.000000e+00> : vector<32x8xf32>
    %10 = tpu.matmul %2, %9, %cst_9 {dimension_numbers = #tpu.dot_dimension_numbers<[1], [0], [0], [1], [0, 0, 1, 1], [], []>} : vector<32x24xf32>, vector<24x8xf32>, vector<32x8xf32> -> vector<32x8xf32>
    %11 = vector.broadcast %4 : vector<32x1xf32> to vector<32x8xf32>
    %12 = arith.addf %10, %11 : vector<32x8xf32>
    %13 = vector.broadcast %5 : vector<32x1xf32> to vector<32x8xf32>
    %14 = arith.mulf %12, %13 : vector<32x8xf32>
    %cst_10 = arith.constant dense<0.000000e+00> : vector<8xf32>
    %15 = vector.multi_reduction <add>, %14, %cst_10 [0] : vector<32x8xf32> to vector<8xf32>
    %16 = vector.shape_cast %15 : vector<8xf32> to vector<1x8xf32>
    %17 = vector.broadcast %6 : vector<1x1xf32> to vector<1x8xf32>
    %18 = arith.addf %16, %17 : vector<1x8xf32>
    %c0_11 = arith.constant 0 : index
    %c0_12 = arith.constant 0 : index
    %19 = vector.load %arg4[%c0_11, %c0_12] : memref<1x8xf32, #tpu.memory_space<vmem>>, vector<1x8xf32>
    tpu.vector_store %arg4[%c0_11, %c0_12], %18 {strides = array<i32>} : memref<1x8xf32, #tpu.memory_space<vmem>>, vector<1x8xf32>,
    return
  }
  func.func @transform_0(%arg0: i32) -> (i32, i32) {
    %c0_i32 = arith.constant 0 : i32
    %c0_i32_0 = arith.constant 0 : i32
    return %c0_i32, %arg0 : i32, i32
  }
  func.func @transform_1(%arg0: i32) -> (i32, i32) {
    %c0_i32 = arith.constant 0 : i32
    %c0_i32_0 = arith.constant 0 : i32
    %c0_i32_1 = arith.constant 0 : i32
    return %c0_i32, %c0_i32_0 : i32, i32
  }
  func.func @transform_2(%arg0: i32) -> (i32, i32) {
    %c0_i32 = arith.constant 0 : i32
    %c0_i32_0 = arith.constant 0 : i32
    %c0_i32_1 = arith.constant 0 : i32
    return %c0_i32, %c0_i32_0 : i32, i32
  }
  func.func @transform_3(%arg0: i32) -> (i32, i32) {
    %c0_i32 = arith.constant 0 : i32
    %c0_i32_0 = arith.constant 0 : i32
    return %c0_i32, %arg0 : i32, i32
  }
}

</mosaic_0001>

<bundles_post_ra>
// kernel: tpu_custom_call.1
= control target key start
LH: loop header
LB: loop body
LE: loop exit
PB: predicated region body
PF: predicated region fallthrough
CT: control target
= control target key end

     0   :  { %v401_v2 = vmov 0.0|0.0   ;;  %vm402_vm0 = vmmov 0   ;;  %v403_v4 = vmov 0.0   ;;  %v404_v5 = vmov 0   ;;  %s500_s0 = inlined_call_operand.vmem [shape: f32[24,8], index: 0, kind: input, shape index: {}]   ;;  %s501_s1 = inlined_call_operand.vmem [shape: f32[56,24], index: 1, kind: input, shape index: {}]   ;;  %s502_s2 = inlined_call_operand.vmem [shape: f32[32,4], index: 2, kind: input, shape index: {}]   ;;  %s503_s3 = inlined_call_operand.hbm [shape: f32[1,8], index: 3, kind: output, shape index: {}]  }
   0x1   :  { %v15_v0 = vld [vmem:[%s500_s0] sm:$0xff]  ;;  %v16_v1 = vld [vmem:[%s500_s0 + $0x8] sm:$0xff]  ;;  %352 = vmatprep.subr.bf16.mxu0 %v401_v2  ;;  %331 = vmatprep.mubr.msk.f32.mxu0 %vm402_vm0, %v403_v4  ;;  %v27_v7 = vld [vmem:[%s502_s2 + $0x10] sm:$0xff] }
   0x2   :  { %v353_v3 = vpack.c.bf16 %v16_v1, %v15_v0  ;;  %367 = vset.pattern.permute.xlu0 %v404_v5  ;;  %v25_v6 = vld [vmem:[%s502_s2] sm:$0xff]  ;;  %368 = vset.pattern.permute.xlu1 %v404_v5 }
   0x3   :  { %32 = vperm.xlu0 %367, %v25_v6  }
   0x4   :  { %354 = vmatpush3.bf16.msra.mxu0 %v353_v3 }
   0x5   :  { %8 = vsyncpa [#allocation3], 0  ;;  %329 = vmatprep.subr.mxu0 %v403_v4  ;;  %v17_v8 = vld [vmem:[%s500_s0 + $0x10] sm:$0xff]  ;;  %v26_v9 = vld [vmem:[%s502_s2 + $0x8] sm:$0xff]  ;;  %42 = vperm.xlu1 %368, %v27_v7   ;;  %vm45_vm1 = vcmask 195584   ;;  %v405_v14 = vmov 1  }
   0x6   :  { %v18_v10 = vld [vmem:[%s501_s1] sm:$0xff]  ;;  %v19_v11 = vld [vmem:[%s501_s1 + $0x8] sm:$0xff]  ;;  %v20_v12 = vld [vmem:[%s501_s1 + $0x10] sm:$0xff]  ;;  %v406_v15 = vmov 2   ;;  %v407_v17 = vmov 3   ;;  %vm269_vm2 = vcmask 64512  }
   0x7   :  { %37 = vperm.xlu0 %367, %v26_v9   ;;  %v21_v13 = vld [vmem:[%s501_s1 + $0x18] sm:$0xff]  ;;  %v29_v18 = vld [vmem:[%s502_s2] sm:$0x1]  ;;  %v23_v33 = vld [vmem:[%s501_s1 + $0x28] sm:$0xff]  ;;  %vm289_vm3 = vcmask 57344  }
   0x8   :  { %330 = vmatpush3.msra.mxu0 %v17_v8  ;;  %346 = vmatprep.mubr.msk.f32.mxu1 %vm45_vm1, %v21_v13  ;;  %v28_v16 = vld [vmem:[%s502_s2 + $0x18] sm:$0xff]  ;;  %v22_v32 = vld [vmem:[%s501_s1 + $0x20] sm:$0xff]  ;;  %v24_v34 = vld [vmem:[%s501_s1 + $0x30] sm:$0xff]  ;;  %s408_s1 = smov [#allocation2]  }
   0x9   :  { %332 = vmatmul.mubr.msk.f32.vlgmr.msra.gmra.mrb[0].mxu0 %vm45_vm1, %v18_v10  ;;  %369 = vset.pattern.permute.xlu1 %v405_v14  ;;  %s297_s13 = sshll.u32 %s408_s1, 4  ;;  %s298_s13 = int_to_ptr.vmem [resolvable:$true] %s297_s13 }
   0xa   :  { %334 = vmatprep.mubr.msk.f32.mxu0 %vm402_vm0, %v403_v4  ;;  %136 = vperm.xlu1 %369, %v25_v6   ;;  %s377_s14 = scalar_lea.vmem %s298_s13, 16  ;;  %s381_s15 = scalar_lea.vmem %s298_s13, 32 }
   0xb   :  { %370 = vset.pattern.permute.xlu0 %v405_v14  ;;  %p378_p0 = scmp.ne.s32.totalorder %s298_s13, %s377_s14  ;;  %p382_p1 = scmp.lt.s32.totalorder %s298_s13, %s298_s13 }
   0xc   :  { %140 = vperm.xlu0 %370, %v26_v9   ;;  %p383_p2 = scmp.lt.s32.totalorder %s381_s15, %s377_s14 }
   0xd   :  { %335 = vmatmul.mubr.msk.f32.gmra.mrb[2].mxu0 %vm45_vm1, %v19_v11 }
   0xe   :  { %337 = vmatprep.mubr.msk.f32.mxu0 %vm402_vm0, %v403_v4  ;;  %144 = vperm.xlu1 %369, %v27_v7   ;;  %p384_p3 = por %p383_p2, %p382_p1 }
  0x10   :  { %372 = vset.pattern.permute.xlu0 %v406_v15  ;;  %p385_p4 = pnand %p384_p3, %p378_p0 }
  0x11   :  { %338 = vmatmul.mubr.msk.f32.gmra.mrb[4].mxu0 %vm45_vm1, %v20_v12  ;;  %254 = vperm.xlu0 %372, %v26_v9  }
  0x12   :  { %371 = vset.pattern.permute.xlu1 %v406_v15 }
  0x13   :  { %250 = vperm.xlu1 %371, %v25_v6  }
  0x15   :  { %262 = vperm.xlu0 %372, %v28_v16  }
  0x17   :  { %373 = vset.pattern.permute.xlu1 %v405_v14 }
  0x18   :  { %149 = vperm.xlu1 %373, %v28_v16  }
  0x19   :  { %376 = vset.pattern.permute.xlu0 %v407_v17 }
  0x1c   :  { %374 = vset.pattern.permute.xlu1 %v406_v15 }
  0x1d   :  { %258 = vperm.xlu1 %374, %v27_v7  }
  0x21   :  { %375 = vset.pattern.permute.xlu1 %v407_v17 }
  0x22   :  { %285 = vperm.xlu1 %375, %v29_v18  }
  0x82   :  { %v33_v19 = vpop.permute.xlu0 %32 }
  0x84   :  { %v43_v27 = vpop.permute.xlu1 %42 }
  0x86   :  { %v38_v22 = vpop.permute.xlu0 %37 }
  0x89   :  { %v137_v35 = vpop.permute.xlu1 %136 }
  0x8b   :  { %v141_v37 = vpop.permute.xlu0 %140 }
  0x8d   :  { %v145_v36 = vpop.permute.xlu1 %144 }
  0x90   :  { %v255_v39 = vpop.permute.xlu0 %254 }
  0x92   :  { %v251_v38 = vpop.permute.xlu1 %250 }
  0x94   :  { %v263_v48 = vpop.permute.xlu0 %262 }
  0x97   :  { %v150_v40 = vpop.permute.xlu1 %149 }
  0x9c   :  { %v259_v52 = vpop.permute.xlu1 %258 }
  0xa1   :  { %v286_v3 = vpop.permute.xlu1 %285 }
  0xdc   :  { %v121_v20 = vpop.f32.mrb[0].mxu0 }
  0xdd   :  { %v333_v21 = vpop.f32.mrb[1].mxu0  ;;  %v122_v24 = vadd.f32 %v121_v20, %v33_v19 }
  0xe0   :  { %v126_v23 = vpop.f32.mrb[2].mxu0 }
  0xe1   :  { %v127_v25 = vadd.f32 %v126_v23, %v38_v22  ;;  %v336_v26 = vpop.f32.mrb[3].mxu0 }
  0xe3   :  { %v355_v28 = vpack.c.bf16 %v127_v25, %v122_v24 }
  0xe4   :  { %v131_v29 = vpop.f32.mrb[4].mxu0 }
  0xe5   :  { %356 = vmatprep.subr.bf16.mxu1 %v355_v28  ;;  %v132_v30 = vadd.f32 %v131_v29, %v43_v27  ;;  %v339_v31 = vpop.f32.mrb[5].mxu0 }
  0xe6   :  { %358 = vmatpush3.bf16.msra.mxu1 %v355_v28 }
  0xe7   :  { %344 = vmatprep.subr.mxu1 %v132_v30 }
  0xea   :  { %345 = vmatpush3.msra.mxu1 %v132_v30 }
  0xeb   :  { %347 = vmatmul.mubr.msk.f32.vlgmr.msra.gmra.mrb[0].mxu1 %vm45_vm1, %v22_v32 }
  0xec   :  { %349 = vmatprep.mubr.msk.f32.mxu1 %vm45_vm1, %v23_v33 }
  0xef   :  { %350 = vmatmul.mubr.msk.f32.gmra.mrb[2].mxu1 %vm45_vm1, %v24_v34 }
 0x1be   :  { %v348_v41 = vpop.f32.mrb[0].mxu1 }
 0x1bf   :  { %v236_v42 = vadd.f32 %v348_v41, %v141_v37  ;;  %v230_v43 = vpop.f32.mrb[1].mxu1 }
 0x1c0   :  { %v231_v44 = vadd.f32 %v230_v43, %v137_v35 }
 0x1c1   :  { %v266_v45 = vmul.f32 %v255_v39, %v236_v42 }
 0x1c2   :  { %v265_v46 = vmul.f32 %v251_v38, %v231_v44  ;;  %v351_v47 = vpop.f32.mrb[2].mxu1 }
 0x1c3   :  { %v271_v49 = vsel %vm269_vm2, %v266_v45, 0.0  ;;  %v246_v50 = vadd.f32 %v351_v47, %v150_v40  ;;  %v240_v51 = vpop.f32.mrb[3].mxu1 }
 0x1c4   :  { %v270_v53 = vsel %vm269_vm2, %v265_v46, 0.0  ;;  %v241_v54 = vadd.f32 %v240_v51, %v145_v36 }
 0x1c5   :  { %v272_v55 = vadd.f32 %v271_v49, %v270_v53  ;;  %v268_v56 = vmul.f32 %v263_v48, %v246_v50 }
 0x1c6   :  { %v267_v57 = vmul.f32 %v259_v52, %v241_v54 }
 0x1c7   :  { %v275_v60 = vsel %vm269_vm2, %v268_v56, 0.0 }
 0x1c8   :  { %v273_v58 = vsel %vm269_vm2, %v267_v57, 0.0 }
 0x1c9   :  { %v274_v59 = vadd.f32 %v273_v58, %v272_v55 }
 0x1cb   :  { %v276_v61 = vadd.f32 %v275_v60, %v274_v59 }
 0x1cd   :  { %v277_v62 = vrot.slane %v276_v61, 4 }
 0x1cf   :  { %v278_v63 = vadd.f32 %v277_v62, %v276_v61 }
 0x1d1   :  { %v279_v0 = vrot.slane %v278_v63, 2 }
 0x1d3   :  { %v280_v1 = vadd.f32 %v279_v0, %v278_v63 }
 0x1d5   :  { %v281_v2 = vrot.slane %v280_v1, 1 }
 0x1d7   :  { %v282_v4 = vadd.f32 %v281_v2, %v280_v1 }
 0x1d9   :  { %v288_v5 = vadd.f32 %v286_v3, %v282_v4 }
 0x1db   :  { %290 = vst.msk [vmem:[#allocation2] sm:$0x1] %vm289_vm3, %v288_v5 }
 0x1dc   :  { %388 = shalt.err (!%p385_p4)
}
 0x1dd   :  { %s389_s18 = scalar_lea.hbm %s503_s3, 16 }
 0x1de   :  { %p390_p5 = scmp.ne.s32.totalorder %s503_s3, %s389_s18  ;;  %p393_p6 = scmp.lt.u32.totalorder %s389_s18, %s503_s3 }
 0x1e0   :  { %p395_p7 = pnand %p393_p6, %p390_p5 }
 0x1e2   :  { %398 = shalt.err (!%p395_p7)
}
 0x1e3   :  { %300 = dma.vmem_to_hbm [thread:$0]  %s298_s13, 16, %s503_s3, [#allocation3]  }
 0x1e4   :  { %399 = dma.done.wait [#allocation3], 16  }
 0x1e5   :  { %400 = vsyncadd [#allocation3], 4294967280 }
 0x1e6   :  { %304 = vsyncpa [#allocation3], 1 }

</bundles_post_ra>
